<compile_context>
chip_gen: v7x
topology: tpu7x:2x2x1
jax: 0.10.0
libtpu: 0.0.40
codegen_flags: <defaults>
</compile_context>

<pallas_src>
import jax
import jax.numpy as jnp
from jax.experimental import pallas as pl
from jax.experimental.pallas import tpu as pltpu


def _lstm_chunk_kernel(x_ref, w_ih_ref, w_hh_ref, b_ref, o_ref, h_sc, c_sc):
    t = pl.program_id(1)  # time-chunk index (sequential / "arbitrary" axis)

    @pl.when(t == 0)
    def _():
        h_sc[...] = jnp.zeros_like(h_sc)
        c_sc[...] = jnp.zeros_like(c_sc)

    H = h_sc.shape[-1]          # hidden size (H_out)
    tc = x_ref.shape[1]         # timesteps per chunk

    # Hoisted input projection for the whole chunk: one MXU pass of
    # (B*TC, H_in) x (H_in, 4H) plus a single bias broadcast-add, instead of a
    # tiny matmul + bias add inside every recurrence step.
    xp = (jnp.einsum("bti,ig->btg", x_ref[...], w_ih_ref[...],
                     preferred_element_type=jnp.float32)
          + b_ref[...])         # (B, TC, 4H)

    h = h_sc[...]               # (B, H)
    c = c_sc[...]               # (B, H)
    w_hh = w_hh_ref[...]        # (H, 4H)

    hs = []
    for j in range(tc):         # static unroll over the chunk (short, fixed)
        gates = xp[:, j, :] + jnp.dot(h, w_hh,
                                      preferred_element_type=jnp.float32)
        # Activate the full 4H-lane gate vector once per nonlinearity (2 EUP
        # passes), then slice — cheaper than 4 activations on 32-lane slices.
        sig = jax.nn.sigmoid(gates)
        tnh = jnp.tanh(gates)
        i_g = sig[:, 0 * H:1 * H]
        f_g = sig[:, 1 * H:2 * H]
        g_g = tnh[:, 2 * H:3 * H]
        o_g = sig[:, 3 * H:4 * H]
        c = f_g * c + i_g * g_g
        h = o_g * jnp.tanh(c)
        hs.append(h)

    h_sc[...] = h
    c_sc[...] = c
    # Lane-dense store: one (B, TC*H_out) slab per chunk (TC*H_out % 128 == 0).
    o_ref[...] = jnp.concatenate(hs, axis=-1).astype(o_ref.dtype)


def lstm_decoder(x, w_ih, w_hh, b_ih, b_hh, *, time_chunk=8):
    """x: (B, T, H_in) batch-first, like nn.LSTM(H_in, H_out, batch_first=True).

    w_ih: (4*H_out, H_in), w_hh: (4*H_out, H_out), b_ih/b_hh: (4*H_out,)
    Returns y: (B, T, H_out).
    """
    B, T, H_in = x.shape
    H_out = w_hh.shape[1]
    G = 4 * H_out

    tc = min(time_chunk, T)
    assert T % tc == 0, "time_chunk must divide T"
    assert (tc * H_out) % 128 == 0, "pick time_chunk so TC*H_out is lane-dense"
    n_chunks = T // tc

    # Transpose the (tiny) weights once so the kernel computes x @ W directly.
    w_ih_t = jnp.transpose(w_ih).astype(jnp.float32)        # (H_in, 4H)
    w_hh_t = jnp.transpose(w_hh).astype(jnp.float32)        # (H_out, 4H)
    bias = (b_ih + b_hh).astype(jnp.float32).reshape(1, G)  # (1, 4H)

    y_flat = pl.pallas_call(
        _lstm_chunk_kernel,
        out_shape=jax.ShapeDtypeStruct((B, T * H_out), jnp.float32),
        grid_spec=pltpu.PrefetchScalarGridSpec(
            num_scalar_prefetch=0,
            # (batch tiles [parallel], time chunks [sequential carry])
            grid=(1, n_chunks),
            in_specs=[
                pl.BlockSpec((B, tc, H_in), lambda b, t: (b, t, 0)),   # x chunk
                pl.BlockSpec((H_in, G), lambda b, t: (0, 0)),          # W_ih^T
                pl.BlockSpec((H_out, G), lambda b, t: (0, 0)),         # W_hh^T
                pl.BlockSpec((1, G), lambda b, t: (0, 0)),             # bias
            ],
            out_specs=pl.BlockSpec((B, tc * H_out), lambda b, t: (b, t)),
            scratch_shapes=[
                pltpu.VMEM((B, H_out), jnp.float32),   # h carry
                pltpu.VMEM((B, H_out), jnp.float32),   # c carry
            ],
        ),
        compiler_params=pltpu.CompilerParams(
            dimension_semantics=("parallel", "arbitrary"),
        ),
    )(x.astype(jnp.float32), w_ih_t, w_hh_t, bias)

    # Contiguous (free) reshape back to batch-first (B, T, H_out).
    return y_flat.reshape(B, T, H_out)


def _lstm_reference(x, w_ih, w_hh, b_ih, b_hh):
    """Pure-JAX reference matching torch.nn.LSTM(batch_first=True)."""
    B, T, _ = x.shape
    H = w_hh.shape[1]
    bias = b_ih + b_hh

    def step(carry, x_t):
        h, c = carry
        gates = x_t @ w_ih.T + h @ w_hh.T + bias
        i = jax.nn.sigmoid(gates[:, 0 * H:1 * H])
        f = jax.nn.sigmoid(gates[:, 1 * H:2 * H])
        g = jnp.tanh(gates[:, 2 * H:3 * H])
        o = jax.nn.sigmoid(gates[:, 3 * H:4 * H])
        c = f * c + i * g
        h = o * jnp.tanh(c)
        return (h, c), h

    h0 = jnp.zeros((B, H), jnp.float32)
    c0 = jnp.zeros((B, H), jnp.float32)
    _, ys = jax.lax.scan(step, (h0, c0), jnp.transpose(x, (1, 0, 2)))
    return jnp.transpose(ys, (1, 0, 2))


if __name__ == "__main__":
    # Shapes consistent with Decoder(hidden_size=64, output_size): LSTM input
    # size 64, hidden (output) size 32; two time chunks exercise the h/c carry.
    B, T, H_IN, H_OUT, TC = 2, 16, 64, 32, 8

    key = jax.random.PRNGKey(0)
    kx, k1, k2, k3, k4 = jax.random.split(key, 5)

    # PyTorch-style uniform init in [-1/sqrt(H_out), 1/sqrt(H_out)].
    scale = 1.0 / jnp.sqrt(jnp.float32(H_OUT))
    w_ih = jax.random.uniform(k1, (4 * H_OUT, H_IN), jnp.float32, -scale, scale)
    w_hh = jax.random.uniform(k2, (4 * H_OUT, H_OUT), jnp.float32, -scale, scale)
    b_ih = jax.random.uniform(k3, (4 * H_OUT,), jnp.float32, -scale, scale)
    b_hh = jax.random.uniform(k4, (4 * H_OUT,), jnp.float32, -scale, scale)

    x = jax.random.normal(kx, (B, T, H_IN), jnp.float32)

    y = lstm_decoder(x, w_ih, w_hh, b_ih, b_hh, time_chunk=TC)
    jax.block_until_ready(y)

    y_ref = _lstm_reference(x, w_ih, w_hh, b_ih, b_hh)
    assert y.shape == (B, T, H_OUT)
    assert jnp.allclose(y, y_ref, atol=1e-5, rtol=1e-5)

    print("KERNEL_OK")
</pallas_src>

<mosaic_0001>
module attributes {stable_mosaic.version = 11 : i64} {
  func.func @_lstm_chunk_kernel(%arg0: i32, %arg1: i32, %arg2: memref<2x8x64xf32, #tpu.memory_space<vmem>>, %arg3: memref<64x128xf32, #tpu.memory_space<vmem>>, %arg4: memref<32x128xf32, #tpu.memory_space<vmem>>, %arg5: memref<1x128xf32, #tpu.memory_space<vmem>>, %arg6: memref<2x256xf32, #tpu.memory_space<vmem>>, %arg7: memref<2x32xf32, #tpu.memory_space<vmem>>, %arg8: memref<2x32xf32, #tpu.memory_space<vmem>>) attributes {dimension_semantics = [#tpu.dimension_semantics<parallel>, #tpu.dimension_semantics<arbitrary>], iteration_bounds = array<i64: 1, 2>, scalar_prefetch = 0 : i64, scratch_operands = 2 : i64, tpu.core_type = #tpu.core_type<tc>, window_params = [{transform_indices = @transform_0, window_bounds = array<i64: 2, 8, 64>}, {pipeline_mode = #tpu.pipeline_mode<synchronous>, transform_indices = @transform_1, window_bounds = array<i64: 64, 128>}, {pipeline_mode = #tpu.pipeline_mode<synchronous>, transform_indices = @transform_2, window_bounds = array<i64: 32, 128>}, {pipeline_mode = #tpu.pipeline_mode<synchronous>, transform_indices = @transform_3, window_bounds = array<i64: 1, 128>}, {transform_indices = @transform_4, window_bounds = array<i64: 2, 256>}]} {
    %c0_i32 = arith.constant 0 : i32
    %0 = arith.cmpi eq, %arg1, %c0_i32 : i32
    %1 = arith.extui %0 : i1 to i32
    %c0_i32_0 = arith.constant 0 : i32
    %2 = arith.cmpi ne, %1, %c0_i32_0 : i32
    scf.if %2 {
      %cst_35 = arith.constant 0.000000e+00 : f32
      %169 = vector.broadcast %cst_35 : f32 to vector<2x32xf32>
      %c0_36 = arith.constant 0 : index
      %c0_37 = arith.constant 0 : index
      %170 = vector.load %arg7[%c0_36, %c0_37] : memref<2x32xf32, #tpu.memory_space<vmem>>, vector<2x32xf32>
      tpu.vector_store %arg7[%c0_36, %c0_37], %169 {strides = array<i32>} : memref<2x32xf32, #tpu.memory_space<vmem>>, vector<2x32xf32>,
      %cst_38 = arith.constant 0.000000e+00 : f32
      %171 = vector.broadcast %cst_38 : f32 to vector<2x32xf32>
      %c0_39 = arith.constant 0 : index
      %c0_40 = arith.constant 0 : index
      %172 = vector.load %arg8[%c0_39, %c0_40] : memref<2x32xf32, #tpu.memory_space<vmem>>, vector<2x32xf32>
      tpu.vector_store %arg8[%c0_39, %c0_40], %171 {strides = array<i32>} : memref<2x32xf32, #tpu.memory_space<vmem>>, vector<2x32xf32>,
    } else {
    }
    %c0 = arith.constant 0 : index
    %c0_1 = arith.constant 0 : index
    %c0_2 = arith.constant 0 : index
    %3 = vector.load %arg2[%c0, %c0_1, %c0_2] : memref<2x8x64xf32, #tpu.memory_space<vmem>>, vector<2x8x64xf32>
    %c0_3 = arith.constant 0 : index
    %c0_4 = arith.constant 0 : index
    %4 = vector.load %arg3[%c0_3, %c0_4] : memref<64x128xf32, #tpu.memory_space<vmem>>, vector<64x128xf32>
    "tpu.trace_start"() <{level = 10 : i32, message = "bti,ig->btg"}> : () -> ()
    %cst = arith.constant dense<0.000000e+00> : vector<2x8x128xf32>
    %5 = tpu.matmul %3, %4, %cst {dimension_numbers = #tpu.dot_dimension_numbers<[2], [0], [0, 1], [1], [0, 0, 0, 1, 1, 1], [], []>} : vector<2x8x64xf32>, vector<64x128xf32>, vector<2x8x128xf32> -> vector<2x8x128xf32>
    "tpu.trace_stop"() : () -> ()
    %c0_5 = arith.constant 0 : index
    %c0_6 = arith.constant 0 : index
    %6 = vector.load %arg5[%c0_5, %c0_6] : memref<1x128xf32, #tpu.memory_space<vmem>>, vector<1x128xf32>
    %7 = vector.shape_cast %6 : vector<1x128xf32> to vector<1x1x128xf32>
    %8 = vector.broadcast %7 : vector<1x1x128xf32> to vector<2x8x128xf32>
    %9 = arith.addf %5, %8 : vector<2x8x128xf32>
    %c0_7 = arith.constant 0 : index
    %c0_8 = arith.constant 0 : index
    %10 = vector.load %arg7[%c0_7, %c0_8] : memref<2x32xf32, #tpu.memory_space<vmem>>, vector<2x32xf32>
    %c0_9 = arith.constant 0 : index
    %c0_10 = arith.constant 0 : index
    %11 = vector.load %arg8[%c0_9, %c0_10] : memref<2x32xf32, #tpu.memory_space<vmem>>, vector<2x32xf32>
    %c0_11 = arith.constant 0 : index
    %c0_12 = arith.constant 0 : index
    %12 = vector.load %arg4[%c0_11, %c0_12] : memref<32x128xf32, #tpu.memory_space<vmem>>, vector<32x128xf32>
    %13 = vector.extract_strided_slice %9 {offsets = [0, 0, 0], sizes = [2, 1, 128], strides = [1, 1, 1]} : vector<2x8x128xf32> to vector<2x1x128xf32>
    %14 = vector.shape_cast %13 : vector<2x1x128xf32> to vector<2x128xf32>
    %cst_13 = arith.constant dense<0.000000e+00> : vector<2x128xf32>
    %15 = tpu.matmul %10, %12, %cst_13 {dimension_numbers = #tpu.dot_dimension_numbers<[1], [0], [0], [1], [0, 0, 1, 1], [], []>} : vector<2x32xf32>, vector<32x128xf32>, vector<2x128xf32> -> vector<2x128xf32>
    %16 = arith.addf %14, %15 : vector<2x128xf32>
    %17 = arith.negf %16 : vector<2x128xf32>
    %18 = math.exp %17 : vector<2x128xf32>
    %cst_14 = arith.constant 1.000000e+00 : f32
    %19 = vector.broadcast %cst_14 : f32 to vector<2x128xf32>
    %20 = arith.addf %19, %18 : vector<2x128xf32>
    %21 = arith.divf %19, %20 : vector<2x128xf32>
    %22 = math.tanh %16 : vector<2x128xf32>
    %23 = vector.extract_strided_slice %21 {offsets = [0, 0], sizes = [2, 32], strides = [1, 1]} : vector<2x128xf32> to vector<2x32xf32>
    %24 = vector.extract_strided_slice %21 {offsets = [0, 32], sizes = [2, 32], strides = [1, 1]} : vector<2x128xf32> to vector<2x32xf32>
    %25 = vector.extract_strided_slice %22 {offsets = [0, 64], sizes = [2, 32], strides = [1, 1]} : vector<2x128xf32> to vector<2x32xf32>
    %26 = vector.extract_strided_slice %21 {offsets = [0, 96], sizes = [2, 32], strides = [1, 1]} : vector<2x128xf32> to vector<2x32xf32>
    %27 = arith.mulf %24, %11 : vector<2x32xf32>
    %28 = arith.mulf %23, %25 : vector<2x32xf32>
    %29 = arith.addf %27, %28 : vector<2x32xf32>
    %30 = math.tanh %29 : vector<2x32xf32>
    %31 = arith.mulf %26, %30 : vector<2x32xf32>
    %32 = vector.extract_strided_slice %9 {offsets = [0, 1, 0], sizes = [2, 1, 128], strides = [1, 1, 1]} : vector<2x8x128xf32> to vector<2x1x128xf32>
    %33 = vector.shape_cast %32 : vector<2x1x128xf32> to vector<2x128xf32>
    %cst_15 = arith.constant dense<0.000000e+00> : vector<2x128xf32>
    %34 = tpu.matmul %31, %12, %cst_15 {dimension_numbers = #tpu.dot_dimension_numbers<[1], [0], [0], [1], [0, 0, 1, 1], [], []>} : vector<2x32xf32>, vector<32x128xf32>, vector<2x128xf32> -> vector<2x128xf32>
    %35 = arith.addf %33, %34 : vector<2x128xf32>
    %36 = arith.negf %35 : vector<2x128xf32>
    %37 = math.exp %36 : vector<2x128xf32>
    %cst_16 = arith.constant 1.000000e+00 : f32
    %38 = vector.broadcast %cst_16 : f32 to vector<2x128xf32>
    %39 = arith.addf %38, %37 : vector<2x128xf32>
    %40 = arith.divf %38, %39 : vector<2x128xf32>
    %41 = math.tanh %35 : vector<2x128xf32>
    %42 = vector.extract_strided_slice %40 {offsets = [0, 0], sizes = [2, 32], strides = [1, 1]} : vector<2x128xf32> to vector<2x32xf32>
    %43 = vector.extract_strided_slice %40 {offsets = [0, 32], sizes = [2, 32], strides = [1, 1]} : vector<2x128xf32> to vector<2x32xf32>
    %44 = vector.extract_strided_slice %41 {offsets = [0, 64], sizes = [2, 32], strides = [1, 1]} : vector<2x128xf32> to vector<2x32xf32>
    %45 = vector.extract_strided_slice %40 {offsets = [0, 96], sizes = [2, 32], strides = [1, 1]} : vector<2x128xf32> to vector<2x32xf32>
    %46 = arith.mulf %43, %29 : vector<2x32xf32>
    %47 = arith.mulf %42, %44 : vector<2x32xf32>
    %48 = arith.addf %46, %47 : vector<2x32xf32>
    %49 = math.tanh %48 : vector<2x32xf32>
    %50 = arith.mulf %45, %49 : vector<2x32xf32>
    %51 = vector.extract_strided_slice %9 {offsets = [0, 2, 0], sizes = [2, 1, 128], strides = [1, 1, 1]} : vector<2x8x128xf32> to vector<2x1x128xf32>
    %52 = vector.shape_cast %51 : vector<2x1x128xf32> to vector<2x128xf32>
    %cst_17 = arith.constant dense<0.000000e+00> : vector<2x128xf32>
    %53 = tpu.matmul %50, %12, %cst_17 {dimension_numbers = #tpu.dot_dimension_numbers<[1], [0], [0], [1], [0, 0, 1, 1], [], []>} : vector<2x32xf32>, vector<32x128xf32>, vector<2x128xf32> -> vector<2x128xf32>
    %54 = arith.addf %52, %53 : vector<2x128xf32>
    %55 = arith.negf %54 : vector<2x128xf32>
    %56 = math.exp %55 : vector<2x128xf32>
    %cst_18 = arith.constant 1.000000e+00 : f32
    %57 = vector.broadcast %cst_18 : f32 to vector<2x128xf32>
    %58 = arith.addf %57, %56 : vector<2x128xf32>
    %59 = arith.divf %57, %58 : vector<2x128xf32>
    %60 = math.tanh %54 : vector<2x128xf32>
    %61 = vector.extract_strided_slice %59 {offsets = [0, 0], sizes = [2, 32], strides = [1, 1]} : vector<2x128xf32> to vector<2x32xf32>
    %62 = vector.extract_strided_slice %59 {offsets = [0, 32], sizes = [2, 32], strides = [1, 1]} : vector<2x128xf32> to vector<2x32xf32>
    %63 = vector.extract_strided_slice %60 {offsets = [0, 64], sizes = [2, 32], strides = [1, 1]} : vector<2x128xf32> to vector<2x32xf32>
    %64 = vector.extract_strided_slice %59 {offsets = [0, 96], sizes = [2, 32], strides = [1, 1]} : vector<2x128xf32> to vector<2x32xf32>
    %65 = arith.mulf %62, %48 : vector<2x32xf32>
    %66 = arith.mulf %61, %63 : vector<2x32xf32>
    %67 = arith.addf %65, %66 : vector<2x32xf32>
    %68 = math.tanh %67 : vector<2x32xf32>
    %69 = arith.mulf %64, %68 : vector<2x32xf32>
    %70 = vector.extract_strided_slice %9 {offsets = [0, 3, 0], sizes = [2, 1, 128], strides = [1, 1, 1]} : vector<2x8x128xf32> to vector<2x1x128xf32>
    %71 = vector.shape_cast %70 : vector<2x1x128xf32> to vector<2x128xf32>
    %cst_19 = arith.constant dense<0.000000e+00> : vector<2x128xf32>
    %72 = tpu.matmul %69, %12, %cst_19 {dimension_numbers = #tpu.dot_dimension_numbers<[1], [0], [0], [1], [0, 0, 1, 1], [], []>} : vector<2x32xf32>, vector<32x128xf32>, vector<2x128xf32> -> vector<2x128xf32>
    %73 = arith.addf %71, %72 : vector<2x128xf32>
    %74 = arith.negf %73 : vector<2x128xf32>
    %75 = math.exp %74 : vector<2x128xf32>
    %cst_20 = arith.constant 1.000000e+00 : f32
    %76 = vector.broadcast %cst_20 : f32 to vector<2x128xf32>
    %77 = arith.addf %76, %75 : vector<2x128xf32>
    %78 = arith.divf %76, %77 : vector<2x128xf32>
    %79 = math.tanh %73 : vector<2x128xf32>
    %80 = vector.extract_strided_slice %78 {offsets = [0, 0], sizes = [2, 32], strides = [1, 1]} : vector<2x128xf32> to vector<2x32xf32>
    %81 = vector.extract_strided_slice %78 {offsets = [0, 32], sizes = [2, 32], strides = [1, 1]} : vector<2x128xf32> to vector<2x32xf32>
    %82 = vector.extract_strided_slice %79 {offsets = [0, 64], sizes = [2, 32], strides = [1, 1]} : vector<2x128xf32> to vector<2x32xf32>
    %83 = vector.extract_strided_slice %78 {offsets = [0, 96], sizes = [2, 32], strides = [1, 1]} : vector<2x128xf32> to vector<2x32xf32>
    %84 = arith.mulf %81, %67 : vector<2x32xf32>
    %85 = arith.mulf %80, %82 : vector<2x32xf32>
    %86 = arith.addf %84, %85 : vector<2x32xf32>
    %87 = math.tanh %86 : vector<2x32xf32>
    %88 = arith.mulf %83, %87 : vector<2x32xf32>
    %89 = vector.extract_strided_slice %9 {offsets = [0, 4, 0], sizes = [2, 1, 128], strides = [1, 1, 1]} : vector<2x8x128xf32> to vector<2x1x128xf32>
    %90 = vector.shape_cast %89 : vector<2x1x128xf32> to vector<2x128xf32>
    %cst_21 = arith.constant dense<0.000000e+00> : vector<2x128xf32>
    %91 = tpu.matmul %88, %12, %cst_21 {dimension_numbers = #tpu.dot_dimension_numbers<[1], [0], [0], [1], [0, 0, 1, 1], [], []>} : vector<2x32xf32>, vector<32x128xf32>, vector<2x128xf32> -> vector<2x128xf32>
    %92 = arith.addf %90, %91 : vector<2x128xf32>
    %93 = arith.negf %92 : vector<2x128xf32>
    %94 = math.exp %93 : vector<2x128xf32>
    %cst_22 = arith.constant 1.000000e+00 : f32
    %95 = vector.broadcast %cst_22 : f32 to vector<2x128xf32>
    %96 = arith.addf %95, %94 : vector<2x128xf32>
    %97 = arith.divf %95, %96 : vector<2x128xf32>
    %98 = math.tanh %92 : vector<2x128xf32>
    %99 = vector.extract_strided_slice %97 {offsets = [0, 0], sizes = [2, 32], strides = [1, 1]} : vector<2x128xf32> to vector<2x32xf32>
    %100 = vector.extract_strided_slice %97 {offsets = [0, 32], sizes = [2, 32], strides = [1, 1]} : vector<2x128xf32> to vector<2x32xf32>
    %101 = vector.extract_strided_slice %98 {offsets = [0, 64], sizes = [2, 32], strides = [1, 1]} : vector<2x128xf32> to vector<2x32xf32>
    %102 = vector.extract_strided_slice %97 {offsets = [0, 96], sizes = [2, 32], strides = [1, 1]} : vector<2x128xf32> to vector<2x32xf32>
    %103 = arith.mulf %100, %86 : vector<2x32xf32>
    %104 = arith.mulf %99, %101 : vector<2x32xf32>
    %105 = arith.addf %103, %104 : vector<2x32xf32>
    %106 = math.tanh %105 : vector<2x32xf32>
    %107 = arith.mulf %102, %106 : vector<2x32xf32>
    %108 = vector.extract_strided_slice %9 {offsets = [0, 5, 0], sizes = [2, 1, 128], strides = [1, 1, 1]} : vector<2x8x128xf32> to vector<2x1x128xf32>
    %109 = vector.shape_cast %108 : vector<2x1x128xf32> to vector<2x128xf32>
    %cst_23 = arith.constant dense<0.000000e+00> : vector<2x128xf32>
    %110 = tpu.matmul %107, %12, %cst_23 {dimension_numbers = #tpu.dot_dimension_numbers<[1], [0], [0], [1], [0, 0, 1, 1], [], []>} : vector<2x32xf32>, vector<32x128xf32>, vector<2x128xf32> -> vector<2x128xf32>
    %111 = arith.addf %109, %110 : vector<2x128xf32>
    %112 = arith.negf %111 : vector<2x128xf32>
    %113 = math.exp %112 : vector<2x128xf32>
    %cst_24 = arith.constant 1.000000e+00 : f32
    %114 = vector.broadcast %cst_24 : f32 to vector<2x128xf32>
    %115 = arith.addf %114, %113 : vector<2x128xf32>
    %116 = arith.divf %114, %115 : vector<2x128xf32>
    %117 = math.tanh %111 : vector<2x128xf32>
    %118 = vector.extract_strided_slice %116 {offsets = [0, 0], sizes = [2, 32], strides = [1, 1]} : vector<2x128xf32> to vector<2x32xf32>
    %119 = vector.extract_strided_slice %116 {offsets = [0, 32], sizes = [2, 32], strides = [1, 1]} : vector<2x128xf32> to vector<2x32xf32>
    %120 = vector.extract_strided_slice %117 {offsets = [0, 64], sizes = [2, 32], strides = [1, 1]} : vector<2x128xf32> to vector<2x32xf32>
    %121 = vector.extract_strided_slice %116 {offsets = [0, 96], sizes = [2, 32], strides = [1, 1]} : vector<2x128xf32> to vector<2x32xf32>
    %122 = arith.mulf %119, %105 : vector<2x32xf32>
    %123 = arith.mulf %118, %120 : vector<2x32xf32>
    %124 = arith.addf %122, %123 : vector<2x32xf32>
    %125 = math.tanh %124 : vector<2x32xf32>
    %126 = arith.mulf %121, %125 : vector<2x32xf32>
    %127 = vector.extract_strided_slice %9 {offsets = [0, 6, 0], sizes = [2, 1, 128], strides = [1, 1, 1]} : vector<2x8x128xf32> to vector<2x1x128xf32>
    %128 = vector.shape_cast %127 : vector<2x1x128xf32> to vector<2x128xf32>
    %cst_25 = arith.constant dense<0.000000e+00> : vector<2x128xf32>
    %129 = tpu.matmul %126, %12, %cst_25 {dimension_numbers = #tpu.dot_dimension_numbers<[1], [0], [0], [1], [0, 0, 1, 1], [], []>} : vector<2x32xf32>, vector<32x128xf32>, vector<2x128xf32> -> vector<2x128xf32>
    %130 = arith.addf %128, %129 : vector<2x128xf32>
    %131 = arith.negf %130 : vector<2x128xf32>
    %132 = math.exp %131 : vector<2x128xf32>
    %cst_26 = arith.constant 1.000000e+00 : f32
    %133 = vector.broadcast %cst_26 : f32 to vector<2x128xf32>
    %134 = arith.addf %133, %132 : vector<2x128xf32>
    %135 = arith.divf %133, %134 : vector<2x128xf32>
    %136 = math.tanh %130 : vector<2x128xf32>
    %137 = vector.extract_strided_slice %135 {offsets = [0, 0], sizes = [2, 32], strides = [1, 1]} : vector<2x128xf32> to vector<2x32xf32>
    %138 = vector.extract_strided_slice %135 {offsets = [0, 32], sizes = [2, 32], strides = [1, 1]} : vector<2x128xf32> to vector<2x32xf32>
    %139 = vector.extract_strided_slice %136 {offsets = [0, 64], sizes = [2, 32], strides = [1, 1]} : vector<2x128xf32> to vector<2x32xf32>
    %140 = vector.extract_strided_slice %135 {offsets = [0, 96], sizes = [2, 32], strides = [1, 1]} : vector<2x128xf32> to vector<2x32xf32>
    %141 = arith.mulf %138, %124 : vector<2x32xf32>
    %142 = arith.mulf %137, %139 : vector<2x32xf32>
    %143 = arith.addf %141, %142 : vector<2x32xf32>
    %144 = math.tanh %143 : vector<2x32xf32>
    %145 = arith.mulf %140, %144 : vector<2x32xf32>
    %146 = vector.extract_strided_slice %9 {offsets = [0, 7, 0], sizes = [2, 1, 128], strides = [1, 1, 1]} : vector<2x8x128xf32> to vector<2x1x128xf32>
    %147 = vector.shape_cast %146 : vector<2x1x128xf32> to vector<2x128xf32>
    %cst_27 = arith.constant dense<0.000000e+00> : vector<2x128xf32>
    %148 = tpu.matmul %145, %12, %cst_27 {dimension_numbers = #tpu.dot_dimension_numbers<[1], [0], [0], [1], [0, 0, 1, 1], [], []>} : vector<2x32xf32>, vector<32x128xf32>, vector<2x128xf32> -> vector<2x128xf32>
    %149 = arith.addf %147, %148 : vector<2x128xf32>
    %150 = arith.negf %149 : vector<2x128xf32>
    %151 = math.exp %150 : vector<2x128xf32>
    %cst_28 = arith.constant 1.000000e+00 : f32
    %152 = vector.broadcast %cst_28 : f32 to vector<2x128xf32>
    %153 = arith.addf %152, %151 : vector<2x128xf32>
    %154 = arith.divf %152, %153 : vector<2x128xf32>
    %155 = math.tanh %149 : vector<2x128xf32>
    %156 = vector.extract_strided_slice %154 {offsets = [0, 0], sizes = [2, 32], strides = [1, 1]} : vector<2x128xf32> to vector<2x32xf32>
    %157 = vector.extract_strided_slice %154 {offsets = [0, 32], sizes = [2, 32], strides = [1, 1]} : vector<2x128xf32> to vector<2x32xf32>
    %158 = vector.extract_strided_slice %155 {offsets = [0, 64], sizes = [2, 32], strides = [1, 1]} : vector<2x128xf32> to vector<2x32xf32>
    %159 = vector.extract_strided_slice %154 {offsets = [0, 96], sizes = [2, 32], strides = [1, 1]} : vector<2x128xf32> to vector<2x32xf32>
    %160 = arith.mulf %157, %143 : vector<2x32xf32>
    %161 = arith.mulf %156, %158 : vector<2x32xf32>
    %162 = arith.addf %160, %161 : vector<2x32xf32>
    %163 = math.tanh %162 : vector<2x32xf32>
    %164 = arith.mulf %159, %163 : vector<2x32xf32>
    %c0_29 = arith.constant 0 : index
    %c0_30 = arith.constant 0 : index
    %165 = vector.load %arg7[%c0_29, %c0_30] : memref<2x32xf32, #tpu.memory_space<vmem>>, vector<2x32xf32>
    tpu.vector_store %arg7[%c0_29, %c0_30], %164 {strides = array<i32>} : memref<2x32xf32, #tpu.memory_space<vmem>>, vector<2x32xf32>,
    %c0_31 = arith.constant 0 : index
    %c0_32 = arith.constant 0 : index
    %166 = vector.load %arg8[%c0_31, %c0_32] : memref<2x32xf32, #tpu.memory_space<vmem>>, vector<2x32xf32>
    tpu.vector_store %arg8[%c0_31, %c0_32], %162 {strides = array<i32>} : memref<2x32xf32, #tpu.memory_space<vmem>>, vector<2x32xf32>,
    %167 = tpu.concatenate %31, %50, %69, %88, %107, %126, %145, %164 in 1 : vector<2x32xf32>, vector<2x32xf32>, vector<2x32xf32>, vector<2x32xf32>, vector<2x32xf32>, vector<2x32xf32>, vector<2x32xf32>, vector<2x32xf32> -> vector<2x256xf32>
    %c0_33 = arith.constant 0 : index
    %c0_34 = arith.constant 0 : index
    %168 = vector.load %arg6[%c0_33, %c0_34] : memref<2x256xf32, #tpu.memory_space<vmem>>, vector<2x256xf32>
    tpu.vector_store %arg6[%c0_33, %c0_34], %167 {strides = array<i32>} : memref<2x256xf32, #tpu.memory_space<vmem>>, vector<2x256xf32>,
    return
  }
  func.func @transform_0(%arg0: i32, %arg1: i32) -> (i32, i32, i32) {
    %c0_i32 = arith.constant 0 : i32
    %c0_i32_0 = arith.constant 0 : i32
    return %arg0, %arg1, %c0_i32 : i32, i32, i32
  }
  func.func @transform_1(%arg0: i32, %arg1: i32) -> (i32, i32) {
    %c0_i32 = arith.constant 0 : i32
    %c0_i32_0 = arith.constant 0 : i32
    %c0_i32_1 = arith.constant 0 : i32
    return %c0_i32, %c0_i32_0 : i32, i32
  }
  func.func @transform_2(%arg0: i32, %arg1: i32) -> (i32, i32) {
    %c0_i32 = arith.constant 0 : i32
    %c0_i32_0 = arith.constant 0 : i32
    %c0_i32_1 = arith.constant 0 : i32
    return %c0_i32, %c0_i32_0 : i32, i32
  }
  func.func @transform_3(%arg0: i32, %arg1: i32) -> (i32, i32) {
    %c0_i32 = arith.constant 0 : i32
    %c0_i32_0 = arith.constant 0 : i32
    %c0_i32_1 = arith.constant 0 : i32
    return %c0_i32, %c0_i32_0 : i32, i32
  }
  func.func @transform_4(%arg0: i32, %arg1: i32) -> (i32, i32) {
    %c0_i32 = arith.constant 0 : i32
    return %arg0, %arg1 : i32, i32
  }
}

</mosaic_0001>

<bundles_post_ra>
// kernel: tpu_custom_call.1
= control target key start
LH: loop header
LB: loop body
LE: loop exit
PB: predicated region body
PF: predicated region fallthrough
CT: control target
= control target key end

     0   :  { %9 = vsyncpa [#allocation5], 0  ;;  %s2826_s0 = inlined_call_operand.hbm [shape: f32[2,16,64], index: 0, kind: input, shape index: {}]   ;;  %s2827_s1 = inlined_call_operand.hbm [shape: f32[64,128], index: 1, kind: input, shape index: {}]   ;;  %s2828_s2 = inlined_call_operand.hbm [shape: f32[32,128], index: 2, kind: input, shape index: {}]   ;;  %s2829_s3 = inlined_call_operand.vmem [shape: f32[1,128], index: 3, kind: input, shape index: {}]   ;;  %s2830_s4 = inlined_call_operand.hbm [shape: f32[2,512], index: 4, kind: output, shape index: {}]  }
   0x1   :  { %11 = vsyncpa [#allocation5 + $0x1], 0 }
   0x2   :  { %12 = vsyncpa [#allocation8], 0 }
   0x3   :  { %13 = vsyncpa [#allocation6], 0 }
   0x4   :  { %15 = vsyncpa [#allocation6 + $0x1], 0  ;;  %s2375_s15 = smov 0   ;;  %s2377_s16 = smov 0  }
   0x5   :  { %s2379_s17 = smov 0   ;;  %s2381_s18 = smov 0  }
   0x6   :  { %s2383_s19 = smov 0   ;;  %s2385_s20 = smov 0  }
   0x7 LB: > { %s1672_s21 = sadd.s32 4294967295, %s2334_s20   ;;  %s1673_s22 = sadd.s32 4294967294, %s2334_s20   ;;  %s2334_s20 = sphi %s2385_s20, %s21_s20   ;;  %s2330_s19 = sphi %s2383_s19, %s2856_s19   ;;  %s2326_s18 = sphi %s2381_s18, %s2855_s18   ;;  %s2322_s17 = sphi %s2379_s17, %s2854_s17   ;;  %s2318_s16 = sphi %s2377_s16, %s2853_s16   ;;  %s2314_s15 = sphi %s2375_s15, %s2852_s15  }
   0x8   : > { %p49_p0 = scmp.ne.s32.totalorder %s2322_s17, %s2318_s16  ;;  %p50_p1 = scmp.eq.s32.totalorder %s2334_s20, 0 }
   0x9   : > { %p55_p2 = scmp.ne.s32.totalorder %s2318_s16, %s2314_s15  ;;  %p2412_p3 = scmp.eq.s32.totalorder %s1672_s21, 0 }
   0xa   : > { %p2416_p4 = por %p50_p1, %p49_p0  ;;  %p144_p5 = scmp.eq.s32.totalorder %s1672_s21, 1 }
   0xb   : > { %s2837_s23 = scalar_select %p2412_p3, 1, 0 }
   0xc   : > { %p2422_p6 = por %p2412_p3, %p55_p2  ;;  %p150_p7 = scmp.eq.s32.totalorder %s1673_s22, 1 }
   0xd   : > { %p2426_p8 = por %p144_p5, %p49_p0  ;;  %p1674_p9 = scmp.ge.s32.totalorder %s2334_s20, 1 }
   0xe   : > { %s2839_s25 = scalar_select %p2422_p6, 1, 0 }
   0xf   : > { %s2840_s26 = scalar_select %p2426_p8, 1, 0 }
  0x10   : > { %p2431_p10 = por %p150_p7, %p55_p2  ;;  %p157_p11 = scmp.lt.s32.totalorder %s2334_s20, 3 }
  0x11   : > { %s2336_s29 = smov [#allocation7]   ;;  %p1970_p1 = scmp.lt.s32.totalorder %s2334_s20, 2 }
  0x12   : > { %s2841_s27 = scalar_select %p2431_p10, 1, 0 }
  0x13   : > { %p2436_p12 = pnand %p1674_p9, %p157_p11  ;;  %s169_s30 = sshll.u32 %s2336_s29, 4  ;;  %s2440_s30 = int_to_ptr.vmem [resolvable:$true] %s169_s30 }
  0x14   : > { %p2454_p2 = pnand %p1970_p1, %p2416_p4  ;;  %s2337_s7 = smov [#allocation9]  }
  0x15   : > { %p1953_p13 = pneg %p2436_p12  ;;  %s182_s8 = sshll.u32 %s2337_s7, 4  ;;  %s2458_s8 = int_to_ptr.vmem [resolvable:$true] %s182_s8 }
  0x16   : > { %s2162_s11 = scalar_lea.hbm %s2827_s1, 1024 }
  0x17   : > { %p2448_p5 = pnand %p1953_p13, %p2412_p3  ;;  %p2163_p7 = scmp.ne.s32.totalorder %s2827_s1, %s2162_s11 }
  0x18   : > { %p2169_p13 = scmp.lt.u32.totalorder %s2162_s11, %s2827_s1 }
  0x19   : > { %p2164_p9 = pneg %p2448_p5 }
  0x1b   : > { %p2165_p4 = pnand %p2164_p9, %p2163_p7 }
  0x1d   : > { %p2166_p11 = pneg %p2165_p4 }
  0x1f   : > { %p2171_p1 = pnand %p2169_p13, %p2166_p11 }
  0x21   : > { %2174 = shalt.err (!%p2171_p1)
}
  0x22   : > { %s2175_s22 = scalar_lea.vmem %s2440_s30, 1024  ;;  %p2183_p3 = scmp.lt.s32.totalorder %s2440_s30, %s2440_s30 }
  0x23   : > { %p2176_p0 = scmp.ne.s32.totalorder %s2440_s30, %s2175_s22  ;;  %p2184_p7 = scmp.lt.s32.totalorder %s2175_s22, %s2175_s22 }
  0x25   : > { %p2178_p10 = pnand %p2176_p0, %p2164_p9  ;;  %p2185_p4 = por %p2184_p7, %p2183_p3 }
  0x27   : > { %p2179_p8 = pneg %p2178_p10 }
  0x29   : > { %p2186_p6 = pnand %p2185_p4, %p2179_p8 }
  0x2b   : > { %2189 = shalt.err (!%p2186_p6)
}
  0x2c   : > { %s2835_s24 = smov 128   ;;  %s2836_s29 = smov 8  }
  0x2d   : > { %1956 = dma.hbm_to_vmem [thread:$0]  (!%p2448_p5), %s2827_s1, 1024, %s2440_s30, [#allocation8], %s2835_s24, %s2835_s24, %s2836_s29  }
  0x2e   : > { %s2190_s12 = scalar_lea.hbm %s2828_s2, 512 }
  0x2f   : > { %p2191_p3 = scmp.ne.s32.totalorder %s2828_s2, %s2190_s12  ;;  %p2197_p10 = scmp.lt.u32.totalorder %s2190_s12, %s2828_s2 }
  0x31   : > { %p2193_p6 = pnand %p2191_p3, %p2164_p9 }
  0x33   : > { %p2194_p8 = pneg %p2193_p6 }
  0x35   : > { %p2199_p0 = pnand %p2197_p10, %p2194_p8 }
  0x37   : > { %2202 = shalt.err (!%p2199_p0)
}
  0x38   : > { %s2203_s30 = scalar_lea.vmem %s2458_s8, 512  ;;  %p2211_p7 = scmp.lt.s32.totalorder %s2458_s8, %s2458_s8 }
  0x39   : > { %p2204_p11 = scmp.ne.s32.totalorder %s2458_s8, %s2203_s30  ;;  %p2212_p4 = scmp.lt.s32.totalorder %s2203_s30, %s2203_s30 }
  0x3b   : > { %p2206_p13 = pnand %p2204_p11, %p2164_p9  ;;  %p2213_p3 = por %p2212_p4, %p2211_p7 }
  0x3d   : > { %p2207_p1 = pneg %p2206_p13 }
  0x3f   : > { %p2214_p6 = pnand %p2213_p3, %p2207_p1 }
  0x41   : > { %2217 = shalt.err (!%p2214_p6)
}
  0x42   : > { %1959 = dma.hbm_to_vmem [thread:$0]  (!%p2448_p5), %s2828_s2, 512, %s2458_s8, [#allocation8], %s2835_s24, %s2835_s24, %s2836_s29  }
  0x43   : > { %s42_s10 = sadd.s32 1, %s2322_s17  ;;  %s30_s11 = sadd.s32 1, %s2330_s19 }
  0x44   : > { %s199_s12 = sand.u32 1, %s2322_s17   ;;  %p31_p9 = scmp.ge.s32.totalorder %s30_s11, 2 }
  0x45   : > { %s1678_s5 = sshll.u32 %s199_s12, 4  ;;  %s1679_s13 = sshll.u32 %s2330_s19, 7 }
  0x46   : > { %s2858_s11 = smov (%p31_p9, %s30_s11), 0  ;;  %s2527_s22 = scalar_lea.hbm %s2826_s0, %s1679_s13 }
  0x47   : > { %s38_s8 = ssub.s32 %s2330_s19, %s2858_s11  ;;  %s203_s30 = scalar_lea.vmem [#allocation4], %s1678_s5 }
  0x48   : > { %s212_s7 = sshll.u32 %s203_s30, 4  ;;  %p40_p5 = scmp.eq.s32.totalorder %s38_s8, 0  ;;  %s2531_s7 = int_to_ptr.vmem [resolvable:$true] %s212_s7 }
  0x49   : > { %s2536_s24 = scalar_lea.sflag [#allocation5], %s199_s12  ;;  %s2218_s29 = scalar_lea.hbm %s2527_s22, 256 }
  0x4a   : > { %s2534_s9 = scalar_select %p40_p5, %s2322_s17, %s42_s10  }
  0x4b   : > { %p2219_p8 = scmp.ne.s32.totalorder %s2527_s22, %s2218_s29  ;;  %p2220_p10 = pneg %p2454_p2 }
  0x4c   : > { %s2223_s5 = scalar_lea.hbm %s2826_s0, 512  ;;  %p2224_p13 = scmp.lt.u32.totalorder %s2527_s22, %s2826_s0 }
  0x4d   : > { %p2221_p0 = pnand %p2220_p10, %p2219_p8  ;;  %p2225_p1 = scmp.lt.u32.totalorder %s2223_s5, %s2218_s29 }
  0x4e   : > { %p2227_p4 = scmp.lt.u32.totalorder %s2218_s29, %s2527_s22 }
  0x4f   : > { %p2222_p11 = pneg %p2221_p0  ;;  %p2226_p7 = por %p2225_p1, %p2224_p13 }
  0x51   : > { %p2228_p3 = por %p2227_p4, %p2226_p7 }
  0x53   : > { %p2229_p6 = pnand %p2228_p3, %p2222_p11 }
  0x55   : > { %2232 = shalt.err (!%p2229_p6)
}
  0x56   : > { %s2233_s10 = scalar_lea.vmem %s2531_s7, 256  ;;  %s2340_s12 = smov [#allocation4]  }
  0x57   : > { %p2234_p9 = scmp.ne.s32.totalorder %s2531_s7, %s2233_s10  ;;  %s2238_s30 = sshll.u32 %s2340_s12, 4  ;;  %s2239_s30 = int_to_ptr.vmem [resolvable:$false] %s2238_s30 }
  0x58   : > { %s2240_s13 = scalar_lea.vmem %s2239_s30, 512  ;;  %p2241_p0 = scmp.lt.s32.totalorder %s2531_s7, %s2239_s30 }
  0x59   : > { %p2236_p5 = pnand %p2234_p9, %p2220_p10  ;;  %p2242_p13 = scmp.lt.s32.totalorder %s2240_s13, %s2233_s10 }
  0x5b   : > { %p2237_p8 = pneg %p2236_p5  ;;  %p2243_p1 = por %p2242_p13, %p2241_p0 }
  0x5d   : > { %p2244_p7 = pnand %p2243_p1, %p2237_p8 }
  0x5f   : > { %2247 = shalt.err (!%p2244_p7)
}
  0x60   : > { %s2341_s29 = smov 256   ;;  %s2845_s14 = smov 8  }
  0x61   : > { %s2846_s5 = smov 128   ;;  %224 = sbr.rel (%p2436_p12) target bundleno = 5804 (0x16ac), region = 36 }
  0x62   : > { %1963 = dma.hbm_to_vmem [thread:$0]  (!%p2454_p2), %s2527_s22, 256, %s2531_s7, %s2536_s24, %s2341_s29, %s2846_s5, %s2845_s14  }
  0x63   : > { %s2569_s21 = sand.u32 (!%p2436_p12), 1, %s2318_s16   ;;  %p2847_p10 = scmp.ne.s32.totalorder (!%p2436_p12), %s2839_s25, 0 }
  0x64   : > { %s1681_s8 = sshll.u32 (!%p2436_p12), %s2569_s21, 4  ;;  %s227_s10 = scalar_lea.sflag (!%p2436_p12), [#allocation5], %s2569_s21 }
  0x65   : > { %s2573_s12 = scalar_lea.vmem (!%p2436_p12), [#allocation4], %s1681_s8 }
  0x68   : > { %2301 = dma.done.wait (%p2847_p10), %s227_s10, 256  }
  0x69   : > { %2303 = vsyncadd (%p2847_p10), %s227_s10, 4294967040  ;;  %p2848_p2 = scmp.ne.s32.totalorder %s2837_s23, 0 }
  0x6b   : > { %2305 = dma.done.wait (%p2848_p2), [#allocation8], 1536  }
  0x6c   : > { %2307 = vsyncadd (%p2848_p2), [#allocation8], 4294965760  ;;  %s1684_s28 = sshll.u32 %s2569_s21, 2  ;;  %p1685_p12 = scmp.ne.s32.totalorder %s2326_s18, 0 }
  0x6d   : > { %s2584_s6 = scalar_lea.vmem [#allocation10], %s1684_s28  ;;  %vm269_vm0 = vcmask (!%p1685_p12), 254976   ;;  %v2342_v0 = vmov (!%p1685_p12), 0.0  }
  0x6e   : > { %268 = sbr.rel (%p1685_p12) target bundleno = 117 (0x75), region = 52  ;;  %270 = vst.msk [vmem:[#allocation2] sm:$0x3] (!%p1685_p12), %vm269_vm0, %v2342_v0  ;;  %271 = vst.msk [vmem:[#allocation3] sm:$0x3] (!%p1685_p12), %vm269_vm0, %v2342_v0 }
  0x75 PF: > { %v274_v1 = vld [vmem:[#allocation7] sm:$0xff]  ;;  %v275_v2 = vld [vmem:[#allocation7 + $0x8] sm:$0xff]  ;;  %v276_v3 = vld [vmem:[#allocation7 + $0x10] sm:$0xff]  ;;  %v2343_v6 = vmov 0.0|0.0   ;;  %vm2344_vm1 = vmmov 0   ;;  %v2345_v8 = vmov 0.0  }
  0x76   : > { %v1877_v4 = vpack.c.bf16 %v275_v2, %v274_v1  ;;  %v277_v5 = vld [vmem:[#allocation7 + $0x18] sm:$0xff]  ;;  %1893 = vmatprep.subr.bf16.mxu1 %v2343_v6  ;;  %v278_v7 = vld [vmem:[#allocation7 + $0x20] sm:$0xff]  ;;  %1797 = vmatprep.mubr.msk.f32.mxu1 %vm2344_vm1, %v2345_v8  ;;  %v279_v10 = vld [vmem:[#allocation7 + $0x28] sm:$0xff]  ;;  %vm289_vm2 = vcmask 523264   ;;  %s2346_s23 = smov 32   ;;  %vm377_vm3 = vcmask 261120  }
  0x77   : > { %v1881_v9 = vpack.c.bf16 %v277_v5, %v276_v3  ;;  %v373_v11 = vld [vmem:[#allocation9] sm:$0xff]  ;;  %v374_v12 = vld [vmem:[#allocation9 + $0x8] sm:$0xff]  ;;  %v375_v14 = vld [vmem:[#allocation9 + $0x10] sm:$0xff]  ;;  %v1885_v17 = vpack.c.bf16 %v279_v10, %v278_v7  ;;  %s2347_s22 = smov 64   ;;  %vm516_vm4 = vcmask 1041409   ;;  %s2348_s7 = smov 96  }
  0x78   : > { %1878 = vmatprep.subr.bf16.mxu0 %v1877_v4  ;;  %v2590_v13 = vpack.c.bf16 %v374_v12, %v373_v11  ;;  %v376_v15 = vld [vmem:[#allocation9 + $0x18] sm:$0xff]  ;;  %v272_v16 = vld [vmem:[%s2573_s12] sm:$0xff]  ;;  %vm1536_vm5 = vcmask 785408   ;;  %s1719_s30 = sshll.u32 %s2326_s18, 6  ;;  %s1570_s13 = sshll.u32 %s2584_s6, 4  ;;  %s2778_s13 = int_to_ptr.vmem [resolvable:$true] %s1570_s13 }
  0x79   : > { %1880 = vmatpush3.bf16.msra.mxu0 %v1877_v4  ;;  %v2594_v18 = vpack.c.bf16 %v376_v15, %v375_v14  ;;  %v372_v19 = vld [vmem:[#allocation3] sm:$0x3]  ;;  %v280_v20 = vld [vmem:[#allocation7 + $0x30] sm:$0xff]  ;;  %1786 = vmatprep.mubr.msk.f32.mxu0 %vm289_vm2, %v272_v16  ;;  %v371_v24 = vld [vmem:[#allocation2] sm:$0x3]  ;;  %s2776_s5 = scalar_lea.hbm %s2830_s4, %s1719_s30  ;;  %s1554_s18 = scalar_lea.sflag [#allocation6], %s2569_s21 }
  0x7a   : > { %1882 = vmatprep.subr.bf16.mxu0 %v1881_v9  ;;  %1895 = vmatpush3.bf16.msra.mxu1 %v2590_v13  ;;  %v281_v21 = vld [vmem:[#allocation7 + $0x38] sm:$0xff]  ;;  %v472_v22 = vrot.slane %v372_v19, 1  ;;  %s2248_s8 = scalar_lea.vmem %s2778_s13, 64  ;;  %p2849_p4 = scmp.ne.s32.totalorder %s2840_s26, 0 }
  0x7b   : > { %1896 = vmatprep.subr.bf16.mxu1 %v2343_v6  ;;  %v1889_v23 = vpack.c.bf16 %v281_v21, %v280_v20  ;;  %v273_v25 = vld [vmem:[%s2573_s12 + $0x8] sm:$0xff]  ;;  %p2249_p11 = scmp.ne.s32.totalorder %s2778_s13, %s2248_s8  ;;  %s2349_s10 = smov [#allocation10]  }
  0x7c   : > { %475 = vrot.lane.b32.xlu1 %v472_v22, %s2346_s23  ;;  %v1686_v28 = vld [vmem:[%s2829_s3] ss:$0 sm:$0xff]  ;;  %s2252_s12 = sshll.u32 %s2349_s10, 4  ;;  %s2253_s12 = int_to_ptr.vmem [resolvable:$false] %s2252_s12 }
  0x7d   : > { %1884 = vmatpush3.bf16.msra.mxu0 %v1881_v9  ;;  %p2250_p3 = pnand %p2249_p11, %p2849_p4  ;;  %s2254_s28 = scalar_lea.vmem %s2253_s12, 128 }
  0x7e   : > { %1886 = vmatprep.subr.bf16.mxu0 %v1885_v17  ;;  %1898 = vmatpush3.bf16.msra.mxu1 %v2594_v18  ;;  %p2255_p9 = scmp.lt.s32.totalorder %s2778_s13, %s2253_s12  ;;  %p2256_p5 = scmp.lt.s32.totalorder %s2254_s28, %s2248_s8 }
  0x7f   : > { %1899 = vmatprep.subr.bf16.mxu1 %v2343_v6  ;;  %p2251_p6 = pneg %p2250_p3 }
  0x80   : > { %473 = vrot.lane.b32.xlu1 %v372_v19, %s2346_s23  ;;  %p2257_p8 = por %p2256_p5, %p2255_p9 }
  0x81   : > { %1888 = vmatpush3.bf16.msra.mxu0 %v1885_v17  ;;  %1798 = vmatmul.mubr.msk.f32.vlgmr.msra.gmra.mrb[0].mxu1 %vm377_vm3, %v371_v24 }
  0x82   : > { %1890 = vmatprep.subr.bf16.mxu0 %v1889_v23  ;;  %1901 = vmatpush3.bf16.msra.mxu1 %v2590_v13  ;;  %p2258_p0 = pnand %p2257_p8, %p2251_p6 }
  0x83   : > { %1808 = vmatprep.mubr.msk.f32.mxu1 %vm2344_vm1, %v2345_v8  ;;  %1902 = vmatprep.subr.bf16.mxu1 %v2343_v6 }
  0x85   : > { %1892 = vmatpush3.bf16.msra.mxu0 %v1889_v23 }
  0x86   : > { %1905 = vmatprep.subr.bf16.mxu0 %v2343_v6  ;;  %1904 = vmatpush3.bf16.msra.mxu1 %v2594_v18 }
  0x87   : > { %1911 = vmatprep.subr.bf16.mxu1 %v2343_v6 }
  0x88   : > { %1787 = vmatmul.mubr.msk.f32.vlgmr.msra.gmra.mrb[0].mxu0 %vm289_vm2, %v273_v25 }
  0x89   : > { %1907 = vmatpush3.bf16.msra.mxu0 %v2590_v13  ;;  %1819 = vmatprep.mubr.msk.f32.mxu0 %vm2344_vm1, %v2345_v8 }
  0x8a   : > { %1908 = vmatprep.subr.bf16.mxu0 %v2343_v6 }
  0x8d   : > { %1910 = vmatpush3.bf16.msra.mxu0 %v2594_v18 }
  0x8e   : > { %1917 = vmatprep.subr.bf16.mxu0 %v2343_v6 }
  0xee   : > { %v476_v50 = vpop.permute.xlu1 %475 }
  0xf2   : > { %v474_v52 = vpop.permute.xlu1 %473 }
 0x154   : > { %v447_v26 = vpop.f32.mrb[0].mxu1 }
 0x155   : > { %v1799_v27 = vpop.f32.mrb[1].mxu1  ;;  %v452_v29 = vrot.slane %v447_v26, 1 }
 0x15b   : > { %v1788_v30 = vpop.f32.mrb[0].mxu0 }
 0x15c   : > { %v2621_v31 = vadd.f32 %v1788_v30, %v1686_v28  ;;  %v362_v32 = vpop.f32.mrb[1].mxu0 }
 0x15d   : > { %v2623_v33 = vadd.f32 %v1686_v28, %v362_v32 }
 0x15e   : > { %v456_v34 = vadd.f32 %v452_v29, %v2621_v31 }
 0x15f   : > { %v455_v35 = vadd.f32 %v447_v26, %v2623_v33 }
 0x160   : > { %2034 = vtanh.f32 %v456_v34  ;;  %v1691_v38 = vmul.f32 -1.442695, %v456_v34 }
 0x161   : > { %2036 = vtanh.f32 %v455_v35  ;;  %v1690_v39 = vmul.f32 -1.442695, %v455_v35 }
 0x162   : > { %2038 = vpow2.f32 %v1691_v38 }
 0x163   : > { %2040 = vpow2.f32 %v1690_v39 }
 0x16a   : > { %v2035_v36 = vpop.eup %2034 }
 0x16b   : > { %485 = vrot.lane.b32.xlu0 %v2035_v36, %s2347_s22  ;;  %v2037_v37 = vpop.eup %2036 }
 0x16c   : > { %v2039_v40 = vpop.eup %2038 }
 0x16d   : > { %v464_v41 = vadd.f32 1.0, %v2039_v40  ;;  %v2041_v42 = vpop.eup %2040 }
 0x16e   : > { %v463_v43 = vadd.f32 1.0, %v2041_v42 }
 0x16f   : > { %483 = vrot.lane.b32.xlu0 %v2037_v37, %s2347_s22  ;;  %2042 = vrcp.f32 %v464_v41 }
 0x170   : > { %2044 = vrcp.f32 %v463_v43 }
 0x179   : > { %v2043_v44 = vpop.eup %2042 }
 0x17a   : > { %v2045_v47 = vpop.eup %2044  ;;  %v480_v51 = vmul.f32 %v2043_v44, %v476_v50 }
 0x17b   : > { %v479_v55 = vmul.f32 %v2045_v47, %v474_v52 }
 0x1dd   : > { %v486_v45 = vpop.permute.xlu0 %485 }
 0x1de   : > { %v490_v46 = vmul.f32 %v2043_v44, %v486_v45 }
 0x1e0   : > { %495 = vrot.lane.b32.xlu0 %v490_v46, %s2346_s23 }
 0x1e1   : > { %v484_v48 = vpop.permute.xlu0 %483 }
 0x1e2   : > { %v489_v49 = vmul.f32 %v2045_v47, %v484_v48 }
 0x1e4   : > { %493 = vrot.lane.b32.xlu1 %v489_v49, %s2346_s23 }
 0x252   : > { %v496_v53 = vpop.permute.xlu0 %495 }
 0x253   : > { %v500_v54 = vadd.f32 %v496_v53, %v480_v51 }
 0x255   : > { %2046 = vtanh.f32 %v500_v54  ;;  %v615_v26 = vrot.slane %v500_v54, 7 }
 0x256   : > { %v494_v56 = vpop.permute.xlu1 %493 }
 0x257   : > { %v499_v57 = vadd.f32 %v494_v56, %v479_v55 }
 0x259   : > { %2048 = vtanh.f32 %v499_v57  ;;  %v614_v28 = vrot.slane %v499_v57, 7 }
 0x25f   : > { %v2047_v58 = vpop.eup %2046 }
 0x260   : > { %507 = vrot.lane.b32.xlu0 %v2047_v58, %s2347_s22 }
 0x263   : > { %v2049_v59 = vpop.eup %2048 }
 0x264   : > { %505 = vrot.lane.b32.xlu1 %v2049_v59, %s2347_s22 }
 0x2d2   : > { %v508_v60 = vpop.permute.xlu0 %507 }
 0x2d3   : > { %v512_v61 = vmul.f32 %v2043_v44, %v508_v60 }
 0x2d5   : > { %v515_v63 = vrot.slane %v512_v61, 7 }
 0x2d6   : > { %v506_v62 = vpop.permute.xlu1 %505 }
 0x2d7   : > { %v511_v0 = vmul.f32 %v2045_v47, %v506_v62 }
 0x2d9   : > { %v517_v1 = vsel %vm516_vm4, %v515_v63, %v511_v0 }
 0x2da   : > { %518 = vrot.lane.b32.xlu0 %v517_v1, %s2346_s23 }
 0x34c   : > { %v2635_v2 = vpop.permute.xlu0 %518 }
 0x34d   : > { %1809 = vmatmul.mubr.msk.f32.vlgmr.msra.gmra.mrb[2].mxu1 %vm377_vm3, %v2635_v2 }
 0x34e   : > { %1913 = vmatpush3.bf16.msra.mxu1 %v2590_v13  ;;  %1830 = vmatprep.mubr.msk.f32.mxu1 %vm2344_vm1, %v2345_v8 }
 0x34f   : > { %1914 = vmatprep.subr.bf16.mxu1 %v2343_v6 }
 0x352   : > { %1916 = vmatpush3.bf16.msra.mxu1 %v2594_v18 }
 0x353   : > { %1923 = vmatprep.subr.bf16.mxu1 %v2343_v6 }
 0x420   : > { %v588_v3 = vpop.f32.mrb[2].mxu1 }
 0x421   : > { %v593_v4 = vrot.slane %v588_v3, 7  ;;  %v597_v5 = vadd.f32 %v588_v3, %v2621_v31  ;;  %v1810_v7 = vpop.f32.mrb[3].mxu1 }
 0x423   : > { %v596_v9 = vadd.f32 %v593_v4, %v2623_v33  ;;  %2050 = vtanh.f32 %v597_v5  ;;  %v1694_v12 = vmul.f32 -1.442695, %v597_v5 }
 0x425   : > { %2052 = vtanh.f32 %v596_v9  ;;  %v1693_v14 = vmul.f32 -1.442695, %v596_v9 }
 0x426   : > { %2054 = vpow2.f32 %v1694_v12 }
 0x427   : > { %2056 = vpow2.f32 %v1693_v14 }
 0x42d   : > { %v2051_v10 = vpop.eup %2050 }
 0x42e   : > { %624 = vrot.lane.b32.xlu0 %v2051_v10, %s2347_s22 }
 0x42f   : > { %v2053_v11 = vpop.eup %2052 }
 0x430   : > { %622 = vrot.lane.b32.xlu1 %v2053_v11, %s2347_s22  ;;  %v2055_v15 = vpop.eup %2054 }
 0x431   : > { %v2057_v16 = vpop.eup %2056  ;;  %v605_v17 = vadd.f32 1.0, %v2055_v15 }
 0x432   : > { %v604_v19 = vadd.f32 1.0, %v2057_v16 }
 0x433   : > { %2058 = vrcp.f32 %v605_v17 }
 0x434   : > { %2060 = vrcp.f32 %v604_v19 }
 0x43d   : > { %v2059_v20 = vpop.eup %2058 }
 0x43e   : > { %v2061_v23 = vpop.eup %2060  ;;  %v619_v27 = vmul.f32 %v2059_v20, %v615_v26 }
 0x43f   : > { %v618_v32 = vmul.f32 %v2061_v23, %v614_v28 }
 0x4a0   : > { %v625_v21 = vpop.permute.xlu0 %624 }
 0x4a1   : > { %v629_v22 = vmul.f32 %v2059_v20, %v625_v21 }
 0x4a2   : > { %v623_v24 = vpop.permute.xlu1 %622 }
 0x4a3   : > { %634 = vrot.lane.b32.xlu0 %v629_v22, %s2346_s23  ;;  %v628_v25 = vmul.f32 %v2061_v23, %v623_v24 }
 0x4a5   : > { %632 = vrot.lane.b32.xlu1 %v628_v25, %s2346_s23 }
 0x515   : > { %v635_v29 = vpop.permute.xlu0 %634 }
 0x516   : > { %v639_v30 = vadd.f32 %v635_v29, %v619_v27 }
 0x517   : > { %v633_v34 = vpop.permute.xlu1 %632 }
 0x518   : > { %2062 = vtanh.f32 %v639_v30  ;;  %v638_v35 = vadd.f32 %v633_v34, %v618_v32  ;;  %v754_v3 = vrot.slane %v639_v30, 7 }
 0x51a   : > { %2064 = vtanh.f32 %v638_v35  ;;  %v753_v1 = vrot.slane %v638_v35, 7 }
 0x522   : > { %v2063_v36 = vpop.eup %2062 }
 0x523   : > { %646 = vrot.lane.b32.xlu0 %v2063_v36, %s2347_s22 }
 0x524   : > { %v2065_v37 = vpop.eup %2064 }
 0x525   : > { %644 = vrot.lane.b32.xlu1 %v2065_v37, %s2347_s22 }
 0x595   : > { %v647_v38 = vpop.permute.xlu0 %646 }
 0x596   : > { %v651_v41 = vmul.f32 %v2059_v20, %v647_v38 }
 0x597   : > { %v645_v39 = vpop.permute.xlu1 %644 }
 0x598   : > { %v650_v40 = vmul.f32 %v2061_v23, %v645_v39 }
 0x59a   : > { %v654_v42 = vrot.slane %v650_v40, 1 }
 0x59c   : > { %v2654_v43 = vsel %vm516_vm4, %v651_v41, %v654_v42 }
 0x59d   : > { %656 = vrot.lane.b32.xlu1 %v2654_v43, %s2346_s23 }
 0x60f   : > { %v657_v44 = vpop.permute.xlu1 %656 }
 0x610   : > { %1820 = vmatmul.mubr.msk.f32.vlgmr.msra.gmra.mrb[2].mxu0 %vm377_vm3, %v657_v44 }
 0x611   : > { %1919 = vmatpush3.bf16.msra.mxu0 %v2590_v13  ;;  %1841 = vmatprep.mubr.msk.f32.mxu0 %vm2344_vm1, %v2345_v8 }
 0x612   : > { %1920 = vmatprep.subr.bf16.mxu0 %v2343_v6 }
 0x615   : > { %1922 = vmatpush3.bf16.msra.mxu0 %v2594_v18 }
 0x616   : > { %1929 = vmatprep.subr.bf16.mxu0 %v2343_v6 }
 0x6e3   : > { %v726_v45 = vpop.f32.mrb[2].mxu0 }
 0x6e4   : > { %v731_v46 = vrot.slane %v726_v45, 6  ;;  %v732_v47 = vrot.slane %v726_v45, 7  ;;  %v1821_v48 = vpop.f32.mrb[3].mxu0 }
 0x6e6   : > { %v735_v49 = vadd.f32 %v731_v46, %v2623_v33  ;;  %v736_v50 = vadd.f32 %v732_v47, %v2621_v31 }
 0x6e8   : > { %2066 = vtanh.f32 %v735_v49  ;;  %v1696_v53 = vmul.f32 -1.442695, %v735_v49  ;;  %v1697_v54 = vmul.f32 -1.442695, %v736_v50 }
 0x6e9   : > { %2068 = vtanh.f32 %v736_v50 }
 0x6ea   : > { %2070 = vpow2.f32 %v1696_v53 }
 0x6eb   : > { %2072 = vpow2.f32 %v1697_v54 }
 0x6f2   : > { %v2067_v51 = vpop.eup %2066 }
 0x6f3   : > { %v2069_v52 = vpop.eup %2068  ;;  %761 = vrot.lane.b32.xlu0 %v2067_v51, %s2347_s22 }
 0x6f4   : > { %763 = vrot.lane.b32.xlu1 %v2069_v52, %s2347_s22  ;;  %v2071_v55 = vpop.eup %2070 }
 0x6f5   : > { %v2073_v56 = vpop.eup %2072  ;;  %v743_v57 = vadd.f32 1.0, %v2071_v55 }
 0x6f6   : > { %v744_v58 = vadd.f32 1.0, %v2073_v56 }
 0x6f7   : > { %2074 = vrcp.f32 %v743_v57 }
 0x6f8   : > { %2076 = vrcp.f32 %v744_v58 }
 0x701   : > { %v2075_v59 = vpop.eup %2074 }
 0x702   : > { %v2077_v61 = vpop.eup %2076  ;;  %v757_v4 = vmul.f32 %v2075_v59, %v753_v1 }
 0x703   : > { %v758_v5 = vmul.f32 %v2077_v61, %v754_v3 }
 0x765   : > { %v762_v60 = vpop.permute.xlu0 %761 }
 0x766   : > { %v764_v62 = vpop.permute.xlu1 %763  ;;  %v767_v63 = vmul.f32 %v2075_v59, %v762_v60 }
 0x767   : > { %v768_v0 = vmul.f32 %v2077_v61, %v764_v62 }
 0x768   : > { %771 = vrot.lane.b32.xlu0 %v767_v63, %s2346_s23 }
 0x769   : > { %773 = vrot.lane.b32.xlu1 %v768_v0, %s2346_s23 }
 0x7da   : > { %v772_v7 = vpop.permute.xlu0 %771 }
 0x7db   : > { %v774_v9 = vpop.permute.xlu1 %773  ;;  %v777_v10 = vadd.f32 %v772_v7, %v757_v4 }
 0x7dc   : > { %v778_v11 = vadd.f32 %v774_v9, %v758_v5 }
 0x7dd   : > { %2078 = vtanh.f32 %v777_v10  ;;  %v893_v47 = vrot.slane %v777_v10, 7 }
 0x7de   : > { %2080 = vtanh.f32 %v778_v11  ;;  %v894_v48 = vrot.slane %v778_v11, 7 }
 0x7e7   : > { %v2079_v12 = vpop.eup %2078 }
 0x7e8   : > { %v2081_v14 = vpop.eup %2080  ;;  %783 = vrot.lane.b32.xlu0 %v2079_v12, %s2347_s22 }
 0x7e9   : > { %785 = vrot.lane.b32.xlu1 %v2081_v14, %s2347_s22 }
 0x85a   : > { %v784_v15 = vpop.permute.xlu0 %783 }
 0x85b   : > { %v786_v16 = vpop.permute.xlu1 %785  ;;  %v789_v17 = vmul.f32 %v2075_v59, %v784_v15 }
 0x85c   : > { %v790_v19 = vmul.f32 %v2077_v61, %v786_v16 }
 0x85d   : > { %v793_v20 = vrot.slane %v789_v17, 2 }
 0x85e   : > { %v794_v21 = vrot.slane %v790_v19, 1 }
 0x860   : > { %v2674_v22 = vsel %vm516_vm4, %v794_v21, %v793_v20 }
 0x861   : > { %796 = vrot.lane.b32.xlu0 %v2674_v22, %s2346_s23 }
 0x8d3   : > { %v797_v23 = vpop.permute.xlu0 %796 }
 0x8d4   : > { %1831 = vmatmul.mubr.msk.f32.vlgmr.msra.gmra.mrb[4].mxu1 %vm377_vm3, %v797_v23 }
 0x8d5   : > { %1925 = vmatpush3.bf16.msra.mxu1 %v2590_v13  ;;  %1852 = vmatprep.mubr.msk.f32.mxu1 %vm2344_vm1, %v2345_v8 }
 0x8d6   : > { %1926 = vmatprep.subr.bf16.mxu1 %v2343_v6 }
 0x8d9   : > { %1928 = vmatpush3.bf16.msra.mxu1 %v2594_v18 }
 0x8da   : > { %1935 = vmatprep.subr.bf16.mxu1 %v2343_v6 }
 0x9a7   : > { %v866_v24 = vpop.f32.mrb[4].mxu1 }
 0x9a8   : > { %v871_v25 = vrot.slane %v866_v24, 5  ;;  %v872_v26 = vrot.slane %v866_v24, 6  ;;  %v1832_v27 = vpop.f32.mrb[5].mxu1 }
 0x9aa   : > { %v875_v28 = vadd.f32 %v871_v25, %v2623_v33  ;;  %v876_v29 = vadd.f32 %v872_v26, %v2621_v31 }
 0x9ac   : > { %2082 = vtanh.f32 %v875_v28  ;;  %v1699_v34 = vmul.f32 -1.442695, %v875_v28  ;;  %v1700_v35 = vmul.f32 -1.442695, %v876_v29 }
 0x9ad   : > { %2084 = vtanh.f32 %v876_v29 }
 0x9ae   : > { %2086 = vpow2.f32 %v1699_v34 }
 0x9af   : > { %2088 = vpow2.f32 %v1700_v35 }
 0x9b6   : > { %v2083_v30 = vpop.eup %2082 }
 0x9b7   : > { %v2085_v32 = vpop.eup %2084  ;;  %901 = vrot.lane.b32.xlu1 %v2083_v30, %s2347_s22 }
 0x9b8   : > { %903 = vrot.lane.b32.xlu0 %v2085_v32, %s2347_s22  ;;  %v2087_v36 = vpop.eup %2086 }
 0x9b9   : > { %v2089_v37 = vpop.eup %2088  ;;  %v883_v38 = vadd.f32 1.0, %v2087_v36 }
 0x9ba   : > { %v884_v39 = vadd.f32 1.0, %v2089_v37 }
 0x9bb   : > { %2090 = vrcp.f32 %v883_v38 }
 0x9bc   : > { %2092 = vrcp.f32 %v884_v39 }
 0x9c5   : > { %v2091_v40 = vpop.eup %2090 }
 0x9c6   : > { %v2093_v42 = vpop.eup %2092  ;;  %v897_v49 = vmul.f32 %v2091_v40, %v893_v47 }
 0x9c7   : > { %v898_v50 = vmul.f32 %v2093_v42, %v894_v48 }
 0xa29   : > { %v902_v41 = vpop.permute.xlu1 %901 }
 0xa2a   : > { %v904_v44 = vpop.permute.xlu0 %903  ;;  %v907_v45 = vmul.f32 %v2091_v40, %v902_v41 }
 0xa2b   : > { %v908_v46 = vmul.f32 %v2093_v42, %v904_v44 }
 0xa2c   : > { %911 = vrot.lane.b32.xlu1 %v907_v45, %s2346_s23 }
 0xa2d   : > { %913 = vrot.lane.b32.xlu0 %v908_v46, %s2346_s23 }
 0xa9e   : > { %v912_v51 = vpop.permute.xlu1 %911 }
 0xa9f   : > { %v914_v52 = vpop.permute.xlu0 %913  ;;  %v917_v53 = vadd.f32 %v912_v51, %v897_v49 }
 0xaa0   : > { %v918_v54 = vadd.f32 %v914_v52, %v898_v50 }
 0xaa1   : > { %2094 = vtanh.f32 %v917_v53  ;;  %v1033_v27 = vrot.slane %v917_v53, 7 }
 0xaa2   : > { %2096 = vtanh.f32 %v918_v54  ;;  %v1034_v28 = vrot.slane %v918_v54, 7 }
 0xaab   : > { %v2095_v55 = vpop.eup %2094 }
 0xaac   : > { %v2097_v56 = vpop.eup %2096  ;;  %923 = vrot.lane.b32.xlu1 %v2095_v55, %s2347_s22 }
 0xaad   : > { %925 = vrot.lane.b32.xlu0 %v2097_v56, %s2347_s22 }
 0xb1e   : > { %v924_v57 = vpop.permute.xlu1 %923 }
 0xb1f   : > { %v926_v58 = vpop.permute.xlu0 %925  ;;  %v929_v59 = vmul.f32 %v2091_v40, %v924_v57 }
 0xb20   : > { %v930_v60 = vmul.f32 %v2093_v42, %v926_v58 }
 0xb21   : > { %v933_v61 = vrot.slane %v929_v59, 3 }
 0xb22   : > { %v934_v62 = vrot.slane %v930_v60, 2 }
 0xb24   : > { %v2694_v63 = vsel %vm516_vm4, %v934_v62, %v933_v61 }
 0xb25   : > { %936 = vrot.lane.b32.xlu1 %v2694_v63, %s2346_s23 }
 0xb97   : > { %v937_v0 = vpop.permute.xlu1 %936 }
 0xb98   : > { %1842 = vmatmul.mubr.msk.f32.vlgmr.msra.gmra.mrb[4].mxu0 %vm377_vm3, %v937_v0 }
 0xb99   : > { %1931 = vmatpush3.bf16.msra.mxu0 %v2590_v13  ;;  %1863 = vmatprep.mubr.msk.f32.mxu0 %vm2344_vm1, %v2345_v8 }
 0xb9a   : > { %1932 = vmatprep.subr.bf16.mxu0 %v2343_v6 }
 0xb9d   : > { %1934 = vmatpush3.bf16.msra.mxu0 %v2594_v18 }
 0xc6b   : > { %v1006_v1 = vpop.f32.mrb[4].mxu0 }
 0xc6c   : > { %v1011_v3 = vrot.slane %v1006_v1, 4  ;;  %v1012_v4 = vrot.slane %v1006_v1, 5  ;;  %v1843_v5 = vpop.f32.mrb[5].mxu0 }
 0xc6e   : > { %v1015_v7 = vadd.f32 %v1011_v3, %v2623_v33  ;;  %v1016_v9 = vadd.f32 %v1012_v4, %v2621_v31 }
 0xc70   : > { %2098 = vtanh.f32 %v1015_v7  ;;  %v1702_v12 = vmul.f32 -1.442695, %v1015_v7  ;;  %v1703_v14 = vmul.f32 -1.442695, %v1016_v9 }
 0xc71   : > { %2100 = vtanh.f32 %v1016_v9 }
 0xc72   : > { %2102 = vpow2.f32 %v1702_v12 }
 0xc73   : > { %2104 = vpow2.f32 %v1703_v14 }
 0xc7a   : > { %v2099_v10 = vpop.eup %2098 }
 0xc7b   : > { %v2101_v11 = vpop.eup %2100  ;;  %1041 = vrot.lane.b32.xlu0 %v2099_v10, %s2347_s22 }
 0xc7c   : > { %1043 = vrot.lane.b32.xlu1 %v2101_v11, %s2347_s22  ;;  %v2103_v15 = vpop.eup %2102 }
 0xc7d   : > { %v2105_v16 = vpop.eup %2104  ;;  %v1023_v17 = vadd.f32 1.0, %v2103_v15 }
 0xc7e   : > { %v1024_v19 = vadd.f32 1.0, %v2105_v16 }
 0xc7f   : > { %2106 = vrcp.f32 %v1023_v17 }
 0xc80   : > { %2108 = vrcp.f32 %v1024_v19 }
 0xc89   : > { %v2107_v20 = vpop.eup %2106 }
 0xc8a   : > { %v2109_v23 = vpop.eup %2108  ;;  %v1037_v29 = vmul.f32 %v2107_v20, %v1033_v27 }
 0xc8b   : > { %v1038_v30 = vmul.f32 %v2109_v23, %v1034_v28 }
 0xced   : > { %v1042_v21 = vpop.permute.xlu0 %1041 }
 0xcee   : > { %v1044_v24 = vpop.permute.xlu1 %1043  ;;  %v1047_v25 = vmul.f32 %v2107_v20, %v1042_v21 }
 0xcef   : > { %v1048_v26 = vmul.f32 %v2109_v23, %v1044_v24 }
 0xcf0   : > { %1051 = vrot.lane.b32.xlu0 %v1047_v25, %s2346_s23 }
 0xcf1   : > { %1053 = vrot.lane.b32.xlu1 %v1048_v26, %s2346_s23 }
 0xd62   : > { %v1052_v32 = vpop.permute.xlu0 %1051 }
 0xd63   : > { %v1054_v34 = vpop.permute.xlu1 %1053  ;;  %v1057_v35 = vadd.f32 %v1052_v32, %v1037_v29 }
 0xd64   : > { %v1058_v36 = vadd.f32 %v1054_v34, %v1038_v30 }
 0xd65   : > { %2110 = vtanh.f32 %v1057_v35  ;;  %v1173_v1 = vrot.slane %v1057_v35, 7 }
 0xd66   : > { %2112 = vtanh.f32 %v1058_v36  ;;  %v1174_v3 = vrot.slane %v1058_v36, 7 }
 0xd6f   : > { %v2111_v37 = vpop.eup %2110 }
 0xd70   : > { %v2113_v38 = vpop.eup %2112  ;;  %1063 = vrot.lane.b32.xlu0 %v2111_v37, %s2347_s22 }
 0xd71   : > { %1065 = vrot.lane.b32.xlu1 %v2113_v38, %s2347_s22 }
 0xde2   : > { %v1064_v39 = vpop.permute.xlu0 %1063 }
 0xde3   : > { %v1066_v40 = vpop.permute.xlu1 %1065  ;;  %v1069_v41 = vmul.f32 %v2107_v20, %v1064_v39 }
 0xde4   : > { %v1070_v42 = vmul.f32 %v2109_v23, %v1066_v40 }
 0xde5   : > { %v1073_v44 = vrot.slane %v1069_v41, 4 }
 0xde6   : > { %v1074_v45 = vrot.slane %v1070_v42, 3 }
 0xde8   : > { %v1075_v46 = vsel %vm516_vm4, %v1074_v45, %v1073_v44 }
 0xde9   : > { %1076 = vrot.lane.b32.xlu0 %v1075_v46, %s2346_s23 }
 0xe5b   : > { %v2714_v47 = vpop.permute.xlu0 %1076 }
 0xe5c   : > { %1853 = vmatmul.mubr.msk.f32.vlgmr.msra.gmra.mrb[6].mxu1 %vm377_vm3, %v2714_v47 }
 0xe5d   : > { %1937 = vmatpush3.bf16.msra.mxu1 %v2590_v13  ;;  %1874 = vmatprep.mubr.msk.f32.mxu1 %vm2344_vm1, %v2345_v8 }
 0xe5e   : > { %1938 = vmatprep.subr.bf16.mxu1 %v2343_v6 }
 0xe61   : > { %1940 = vmatpush3.bf16.msra.mxu1 %v2594_v18 }
 0xf2f   : > { %v1146_v48 = vpop.f32.mrb[6].mxu1 }
 0xf30   : > { %v1151_v49 = vrot.slane %v1146_v48, 3  ;;  %v1152_v50 = vrot.slane %v1146_v48, 4  ;;  %v1854_v51 = vpop.f32.mrb[7].mxu1 }
 0xf32   : > { %v1155_v52 = vadd.f32 %v1151_v49, %v2623_v33  ;;  %v1156_v53 = vadd.f32 %v1152_v50, %v2621_v31 }
 0xf34   : > { %2114 = vtanh.f32 %v1155_v52  ;;  %v1705_v8 = vmul.f32 -1.442695, %v1155_v52  ;;  %v1706_v6 = vmul.f32 -1.442695, %v1156_v53 }
 0xf35   : > { %2116 = vtanh.f32 %v1156_v53 }
 0xf36   : > { %2118 = vpow2.f32 %v1705_v8 }
 0xf37   : > { %2120 = vpow2.f32 %v1706_v6 }
 0xf3e   : > { %v2115_v54 = vpop.eup %2114 }
 0xf3f   : > { %v2117_v55 = vpop.eup %2116  ;;  %1181 = vrot.lane.b32.xlu1 %v2115_v54, %s2347_s22 }
 0xf40   : > { %1183 = vrot.lane.b32.xlu0 %v2117_v55, %s2347_s22  ;;  %v2119_v13 = vpop.eup %2118 }
 0xf41   : > { %v2121_v18 = vpop.eup %2120  ;;  %v1163_v56 = vadd.f32 1.0, %v2119_v13 }
 0xf42   : > { %v1164_v57 = vadd.f32 1.0, %v2121_v18 }
 0xf43   : > { %2122 = vrcp.f32 %v1163_v56 }
 0xf44   : > { %2124 = vrcp.f32 %v1164_v57 }
 0xf4d   : > { %v2123_v58 = vpop.eup %2122 }
 0xf4e   : > { %v2125_v60 = vpop.eup %2124  ;;  %v1177_v4 = vmul.f32 %v2123_v58, %v1173_v1 }
 0xf4f   : > { %v1178_v5 = vmul.f32 %v2125_v60, %v1174_v3 }
 0xfb1   : > { %v1182_v59 = vpop.permute.xlu1 %1181 }
 0xfb2   : > { %v1184_v61 = vpop.permute.xlu0 %1183  ;;  %v1187_v62 = vmul.f32 %v2123_v58, %v1182_v59 }
 0xfb3   : > { %v1188_v0 = vmul.f32 %v2125_v60, %v1184_v61 }
 0xfb4   : > { %1191 = vrot.lane.b32.xlu1 %v1187_v62, %s2346_s23 }
 0xfb5   : > { %1193 = vrot.lane.b32.xlu0 %v1188_v0, %s2346_s23 }
0x1026   : > { %v1192_v7 = vpop.permute.xlu1 %1191 }
0x1027   : > { %v1194_v9 = vpop.permute.xlu0 %1193  ;;  %v1197_v10 = vadd.f32 %v1192_v7, %v1177_v4 }
0x1028   : > { %v1198_v11 = vadd.f32 %v1194_v9, %v1178_v5 }
0x1029   : > { %2126 = vtanh.f32 %v1197_v10  ;;  %v1313_v49 = vrot.slane %v1197_v10, 7 }
0x102a   : > { %2128 = vtanh.f32 %v1198_v11  ;;  %v1314_v50 = vrot.slane %v1198_v11, 7 }
0x1033   : > { %v2127_v12 = vpop.eup %2126 }
0x1034   : > { %v2129_v14 = vpop.eup %2128  ;;  %1203 = vrot.lane.b32.xlu1 %v2127_v12, %s2347_s22 }
0x1035   : > { %1205 = vrot.lane.b32.xlu0 %v2129_v14, %s2347_s22 }
0x10a6   : > { %v1204_v15 = vpop.permute.xlu1 %1203 }
0x10a7   : > { %v1206_v16 = vpop.permute.xlu0 %1205  ;;  %v1209_v17 = vmul.f32 %v2123_v58, %v1204_v15 }
0x10a8   : > { %v1210_v19 = vmul.f32 %v2125_v60, %v1206_v16 }
0x10a9   : > { %v1213_v20 = vrot.slane %v1209_v17, 5 }
0x10aa   : > { %v1214_v21 = vrot.slane %v1210_v19, 4 }
0x10ac   : > { %v2732_v23 = vsel %vm516_vm4, %v1214_v21, %v1213_v20 }
0x10ad   : > { %1216 = vrot.lane.b32.xlu1 %v2732_v23, %s2346_s23 }
0x111f   : > { %v1217_v24 = vpop.permute.xlu1 %1216 }
0x1120   : > { %1864 = vmatmul.mubr.msk.f32.vlgmr.msra.gmra.mrb[6].mxu0 %vm377_vm3, %v1217_v24 }
0x11f3   : > { %v1286_v25 = vpop.f32.mrb[6].mxu0 }
0x11f4   : > { %v1291_v26 = vrot.slane %v1286_v25, 2  ;;  %v1292_v27 = vrot.slane %v1286_v25, 3  ;;  %v1865_v28 = vpop.f32.mrb[7].mxu0 }
0x11f6   : > { %v1295_v29 = vadd.f32 %v1291_v26, %v2623_v33  ;;  %v1296_v30 = vadd.f32 %v1292_v27, %v2621_v31 }
0x11f8   : > { %2130 = vtanh.f32 %v1295_v29  ;;  %v1708_v35 = vmul.f32 -1.442695, %v1295_v29  ;;  %v1709_v36 = vmul.f32 -1.442695, %v1296_v30 }
0x11f9   : > { %2132 = vtanh.f32 %v1296_v30 }
0x11fa   : > { %2134 = vpow2.f32 %v1708_v35 }
0x11fb   : > { %2136 = vpow2.f32 %v1709_v36 }
0x1202   : > { %v2131_v32 = vpop.eup %2130 }
0x1203   : > { %v2133_v34 = vpop.eup %2132  ;;  %1321 = vrot.lane.b32.xlu0 %v2131_v32, %s2347_s22 }
0x1204   : > { %1323 = vrot.lane.b32.xlu1 %v2133_v34, %s2347_s22  ;;  %v2135_v37 = vpop.eup %2134 }
0x1205   : > { %v2137_v38 = vpop.eup %2136  ;;  %v1303_v39 = vadd.f32 1.0, %v2135_v37 }
0x1206   : > { %v1304_v40 = vadd.f32 1.0, %v2137_v38 }
0x1207   : > { %2138 = vrcp.f32 %v1303_v39 }
0x1208   : > { %2140 = vrcp.f32 %v1304_v40 }
0x1211   : > { %v2139_v41 = vpop.eup %2138 }
0x1212   : > { %v2141_v44 = vpop.eup %2140  ;;  %v1317_v51 = vmul.f32 %v2139_v41, %v1313_v49 }
0x1213   : > { %v1318_v52 = vmul.f32 %v2141_v44, %v1314_v50 }
0x1275   : > { %v1322_v42 = vpop.permute.xlu0 %1321 }
0x1276   : > { %v1324_v45 = vpop.permute.xlu1 %1323  ;;  %v1327_v46 = vmul.f32 %v2139_v41, %v1322_v42 }
0x1277   : > { %v1328_v48 = vmul.f32 %v2141_v44, %v1324_v45 }
0x1278   : > { %1331 = vrot.lane.b32.xlu0 %v1327_v46, %s2346_s23 }
0x1279   : > { %1333 = vrot.lane.b32.xlu1 %v1328_v48, %s2346_s23 }
0x12ea   : > { %v1332_v53 = vpop.permute.xlu0 %1331 }
0x12eb   : > { %v1334_v54 = vpop.permute.xlu1 %1333  ;;  %v1337_v55 = vadd.f32 %v1332_v53, %v1317_v51 }
0x12ec   : > { %v1338_v8 = vadd.f32 %v1334_v54, %v1318_v52 }
0x12ed   : > { %2142 = vtanh.f32 %v1337_v55  ;;  %v1453_v25 = vrot.slane %v1337_v55, 7 }
0x12ee   : > { %2144 = vtanh.f32 %v1338_v8  ;;  %v1454_v26 = vrot.slane %v1338_v8, 7 }
0x12f7   : > { %v2143_v6 = vpop.eup %2142 }
0x12f8   : > { %v2145_v13 = vpop.eup %2144  ;;  %1343 = vrot.lane.b32.xlu0 %v2143_v6, %s2347_s22 }
0x12f9   : > { %1345 = vrot.lane.b32.xlu1 %v2145_v13, %s2347_s22 }
0x136a   : > { %v1344_v18 = vpop.permute.xlu0 %1343 }
0x136b   : > { %v1346_v56 = vpop.permute.xlu1 %1345  ;;  %v1349_v57 = vmul.f32 %v2139_v41, %v1344_v18 }
0x136c   : > { %v1350_v58 = vmul.f32 %v2141_v44, %v1346_v56 }
0x136d   : > { %v1353_v59 = vrot.slane %v1349_v57, 6 }
0x136e   : > { %v1354_v60 = vrot.slane %v1350_v58, 5 }
0x1370   : > { %v1355_v61 = vsel %vm516_vm4, %v1354_v60, %v1353_v59 }
0x1371   : > { %1356 = vrot.lane.b32.xlu0 %v1355_v61, %s2346_s23 }
0x13e3   : > { %v1357_v62 = vpop.permute.xlu0 %1356 }
0x13e4   : > { %1875 = vmatmul.mubr.msk.f32.vlgmr.msra.gmra.mrb[8].mxu1 %vm377_vm3, %v1357_v62 }
0x14b7   : > { %v1426_v0 = vpop.f32.mrb[8].mxu1 }
0x14b8   : > { %v1431_v1 = vrot.slane %v1426_v0, 1  ;;  %v1432_v3 = vrot.slane %v1426_v0, 2  ;;  %v1876_v4 = vpop.f32.mrb[9].mxu1 }
0x14ba   : > { %v1435_v5 = vadd.f32 %v1431_v1, %v2623_v33  ;;  %v1436_v7 = vadd.f32 %v1432_v3, %v2621_v31 }
0x14bc   : > { %2146 = vtanh.f32 %v1435_v5  ;;  %v1711_v11 = vmul.f32 -1.442695, %v1435_v5  ;;  %v1712_v12 = vmul.f32 -1.442695, %v1436_v7 }
0x14bd   : > { %2148 = vtanh.f32 %v1436_v7 }
0x14be   : > { %2150 = vpow2.f32 %v1711_v11 }
0x14bf   : > { %2152 = vpow2.f32 %v1712_v12 }
0x14c6   : > { %v2147_v9 = vpop.eup %2146 }
0x14c7   : > { %v2149_v10 = vpop.eup %2148  ;;  %1461 = vrot.lane.b32.xlu0 %v2147_v9, %s2347_s22 }
0x14c8   : > { %1463 = vrot.lane.b32.xlu1 %v2149_v10, %s2347_s22  ;;  %v2151_v14 = vpop.eup %2150 }
0x14c9   : > { %v2153_v15 = vpop.eup %2152  ;;  %v1443_v16 = vadd.f32 1.0, %v2151_v14 }
0x14ca   : > { %v1444_v17 = vadd.f32 1.0, %v2153_v15 }
0x14cb   : > { %2154 = vrcp.f32 %v1443_v16 }
0x14cc   : > { %2156 = vrcp.f32 %v1444_v17 }
0x14d5   : > { %v2155_v33 = vpop.eup %2154 }
0x14d6   : > { %v2157_v19 = vpop.eup %2156  ;;  %v1457_v27 = vmul.f32 %v2155_v33, %v1453_v25 }
0x14d7   : > { %v1458_v28 = vmul.f32 %v2157_v19, %v1454_v26 }
0x1539   : > { %v1462_v31 = vpop.permute.xlu0 %1461 }
0x153a   : > { %v1464_v20 = vpop.permute.xlu1 %1463  ;;  %v1467_v21 = vmul.f32 %v2155_v33, %v1462_v31 }
0x153b   : > { %v1468_v24 = vmul.f32 %v2157_v19, %v1464_v20 }
0x153c   : > { %1471 = vrot.lane.b32.xlu0 %v1467_v21, %s2346_s23 }
0x153d   : > { %1473 = vrot.lane.b32.xlu1 %v1468_v24, %s2346_s23 }
0x15ae   : > { %v1472_v29 = vpop.permute.xlu0 %1471 }
0x15af   : > { %v1474_v30 = vpop.permute.xlu1 %1473  ;;  %v1477_v32 = vadd.f32 %v1472_v29, %v1457_v27 }
0x15b0   : > { %v1478_v34 = vadd.f32 %v1474_v30, %v1458_v28 }
0x15b1   : > { %2158 = vtanh.f32 %v1477_v32 }
0x15b2   : > { %2160 = vtanh.f32 %v1478_v34 }
0x15bb   : > { %v2159_v35 = vpop.eup %2158 }
0x15bc   : > { %v2161_v36 = vpop.eup %2160  ;;  %1483 = vrot.lane.b32.xlu0 %v2159_v35, %s2347_s22 }
0x15bd   : > { %1485 = vrot.lane.b32.xlu1 %v2161_v36, %s2347_s22 }
0x15c0   : > { %1524 = vrot.lane.b32.xlu0 %v2732_v23, %s2347_s22 }
0x15c1   : > { %1516 = vrot.lane.b32.xlu1 %v2654_v43, %s2347_s22  ;;  %v1506_v43 = vrot.slane %v1478_v34, 7 }
0x15c4   : > { %1527 = vrot.lane.b32.xlu0 %v1355_v61, %s2348_s7 }
0x15c5   : > { %1519 = vrot.lane.b32.xlu1 %v2674_v22, %s2348_s7 }
0x162e   : > { %v1484_v37 = vpop.permute.xlu0 %1483 }
0x162f   : > { %v1486_v38 = vpop.permute.xlu1 %1485  ;;  %v1489_v39 = vmul.f32 %v2155_v33, %v1484_v37 }
0x1630   : > { %v1490_v40 = vmul.f32 %v2157_v19, %v1486_v38 }
0x1631   : > { %1494 = vrot.lane.b32.xlu1 %v1489_v39, %s2346_s23  ;;  %v1530_v45 = vrot.slane %v1489_v39, 7 }
0x1632   : > { %v1493_v41 = vrot.slane %v1490_v40, 7  ;;  %v1525_v42 = vpop.permute.xlu0 %1524  ;;  %v1531_v44 = vrot.slane %v1490_v40, 6 }
0x1633   : > { %v1517_v23 = vpop.permute.xlu1 %1516  ;;  %v1538_v22 = vsel %vm377_vm3, %v2714_v47, %v1525_v42 }
0x1634   : > { %1496 = vrot.lane.b32.xlu0 %v1493_v41, %s2346_s23  ;;  %v1534_v48 = vsel %vm377_vm3, %v2635_v2, %v1517_v23  ;;  %v1532_v50 = vsel %vm516_vm4, %v1531_v44, %v1530_v45 }
0x1635   : > { %1507 = vrot.lane.b32.xlu1 %v1477_v32, %s2348_s7 }
0x1636   : > { %v1528_v46 = vpop.permute.xlu0 %1527 }
0x1637   : > { %v1520_v49 = vpop.permute.xlu1 %1519  ;;  %v1539_v51 = vsel %vm289_vm2, %v1538_v22, %v1528_v46 }
0x1638   : > { %v1535_v52 = vsel %vm289_vm2, %v1534_v48, %v1520_v49  ;;  %v1540_v53 = vsel %vm1536_vm5, %v1539_v51, %v1532_v50  ;;  %1509 = vrot.lane.b32.xlu0 %v1506_v43, %s2348_s7 }
0x1639   : > { %v1537_v54 = vsel %vm1536_vm5, %v1535_v52, %v2694_v63 }
0x163a   : > { %v1543_v47 = vcombine.low %v1537_v54, %v1540_v53 }
0x163c   : > { %1713 = vst.sshfl [vmem:[%s2584_s6] sm:$0x33 pattern:$0x76325410] %v1543_v47 }
0x163d   : > { %2261 = shalt.err (!%p2258_p0)
}
0x163e   : > { %s2262_s21 = scalar_lea.hbm %s2776_s5, 64  ;;  %s2266_s25 = scalar_lea.hbm %s2830_s4, 128 }
0x163f   : > { %p2263_p13 = scmp.ne.s32.totalorder %s2776_s5, %s2262_s21  ;;  %p2267_p10 = scmp.lt.u32.totalorder %s2776_s5, %s2830_s4 }
0x1640   : > { %p2268_p2 = scmp.lt.u32.totalorder %s2266_s25, %s2262_s21  ;;  %p2270_p11 = scmp.lt.u32.totalorder %s2262_s21, %s2776_s5 }
0x1641   : > { %p2264_p1 = pnand %p2263_p13, %p2849_p4 }
0x1642   : > { %p2269_p12 = por %p2268_p2, %p2267_p10 }
0x1643   : > { %p2265_p7 = pneg %p2264_p1 }
0x1644   : > { %p2271_p3 = por %p2270_p11, %p2269_p12 }
0x1646   : > { %p2272_p6 = pnand %p2271_p3, %p2265_p7 }
0x1648   : > { %2275 = shalt.err (!%p2272_p6)
}
0x1649   : > { %1951 = dma.vmem_to_hbm [thread:$0]  (%p2849_p4), %s2778_s13, 64, %s2776_s5, %s1554_s18   ;;  %vm1500_vm6 = vcmask 261127   ;;  %vm1502_vm7 = vcmask 253952  }
0x16a3   : > { %v1495_v2 = vpop.permute.xlu1 %1494 }
0x16a4   : > { %1501 = vst.msk [vmem:[#allocation2 - $0x7] sm:$0x80] %vm1500_vm6, %v1495_v2 }
0x16a6   : > { %v1497_v63 = vpop.permute.xlu0 %1496 }
0x16a7   : > { %1503 = vst.msk [vmem:[#allocation2 + $0x1] sm:$0x1] %vm1502_vm7, %v1497_v63  ;;  %v1508_v55 = vpop.permute.xlu1 %1507 }
0x16a8   : > { %1513 = vst.msk [vmem:[#allocation3 - $0x7] sm:$0x80] %vm1500_vm6, %v1508_v55 }
0x16aa   : > { %v1510_v8 = vpop.permute.xlu0 %1509 }
0x16ab   : > { %1514 = vst.msk [vmem:[#allocation3 + $0x1] sm:$0x1] %vm1502_vm7, %v1510_v8 }
0x16ac PF: > { %s1582_s7 = sand.u32 1, %s2314_s15   ;;  %p2850_p9 = scmp.ne.s32.totalorder %s2841_s27, 0 }
0x16ad   : > { %p2851_p5 = scmp.ge.s32.totalorder %s2334_s20, 2  ;;  %s1583_s26 = scalar_lea.sflag [#allocation6], %s1582_s7 }
0x16af   : > { %p1965_p8 = pnand %p2851_p5, %p2850_p9 }
0x16b1   : > { %2309 = dma.done.wait (!%p1965_p8), %s1583_s26, 64  }
0x16b2   : > { %2311 = vsyncadd (!%p1965_p8), %s1583_s26, 4294967232  ;;  %s21_s20 = sadd.s32 1, %s2334_s20   ;;  %s2852_s15 = smov %s2318_s16 }
0x16b3   : > { %p18_p4 = scmp.ge.s32.totalorder %s21_s20, 4   ;;  %s2853_s16 = smov %s2322_s17 }
0x16b4   : > { %s2854_s17 = smov %s2534_s9  ;;  %s2855_s18 = smov %s2330_s19 }
0x16b5   : > { %s2856_s19 = smov %s2858_s11  ;;  %20 = sbr.rel (!%p18_p4) target bundleno = 7 (0x7), region = 93 }
0x16bc   :  { %1588 = vsyncpa [#allocation5], 1 }
0x16bd   :  { %1590 = vsyncpa [#allocation5 + $0x1], 1 }
0x16be   :  { %1591 = vsyncpa [#allocation8], 1 }
0x16bf   :  { %1592 = vsyncpa [#allocation6], 1 }
0x16c0   :  { %1594 = vsyncpa [#allocation6 + $0x1], 1 }

</bundles_post_ra>
